<compile_context>
chip_gen: v5e
topology: v5e:2x2
jax: 0.10.0
libtpu: 0.0.40
codegen_flags: <defaults>
</compile_context>

<pallas_src>
import math
import jax
import jax.numpy as jnp
from jax.experimental import pallas as pl
from jax.experimental.pallas import tpu as pltpu

# ----- model hyper-parameters (small, consistent with module structure) -----
DIM_MODEL = 32
NUM_HEADS = 4
DIM_HEAD = DIM_MODEL // NUM_HEADS   # 8
BATCH = 2
SEQ_LEN = 8
DOT_SCALE = math.sqrt(DIM_HEAD)     # torch: sqrt(dim_head)


def mha_kernel(x_ref, pmask_ref, wqkv_ref, bqkv_ref, wc_ref, bc_ref, o_ref):
    """Single invocation; whole (tiny) problem lives in VMEM.

    x_ref:     (B*S, D)   flattened activations
    pmask_ref: (B, S)     key-padding mask (1.0 == padded)
    wqkv_ref:  (D, 3D)    fused [Wq * 1/sqrt(Dh) | Wk | Wv]
    bqkv_ref:  (1, 3D)    fused [bq * 1/sqrt(Dh) | bk | bv]
    wc_ref:    (D, D)     output projection (fc_concat), pre-transposed
    bc_ref:    (1, D)
    o_ref:     (B*S, D)
    """
    B, S = pmask_ref.shape
    BS, D = x_ref.shape
    H, Dh = NUM_HEADS, DIM_HEAD

    # Read weights once; the head loop below slices VALUES, not Refs.
    wc = wc_ref[...]

    # One fused QKV projection: a single MXU pass over all batch*seq rows.
    qkv = jnp.dot(x_ref[...], wqkv_ref[...],
                  preferred_element_type=jnp.float32) + bqkv_ref[...]     # (BS, 3D)
    qkv3 = qkv.reshape(B, S, 3 * D)                                        # sublane split only

    # Key-padding additive bias (-inf on padded keys), computed + broadcast once
    # (hoisted out of the head loop).  NOTE: a row whose keys are ALL padded yields
    # NaN, matching torch's masked_fill(-inf) + softmax behavior.
    bias = jnp.where(pmask_ref[...] > 0.5, -jnp.inf, 0.0)                  # (B, S)
    bias_b = jnp.broadcast_to(bias[:, None, :], (B, S, S))                 # (B, Sq, Sk)

    # Accumulate the output projection per head: out = sum_h (A_h V_h) Wc[h*Dh:(h+1)*Dh] + bc.
    acc = jnp.broadcast_to(bc_ref[...], (BS, D)).astype(jnp.float32)
    for h in range(H):                                  # static unroll, H = 4
        q_h = qkv3[:, :, h * Dh:(h + 1) * Dh]           # (B,S,Dh), already scaled by 1/sqrt(Dh)
        k_h = qkv3[:, :, D + h * Dh:D + (h + 1) * Dh]   # (B,S,Dh)
        v_h = qkv3[:, :, 2 * D + h * Dh:2 * D + (h + 1) * Dh]

        # Batched over B: no explicit k.T transpose, contraction on the last axes.
        scores = jnp.einsum('bqd,bkd->bqk', q_h, k_h,
                            preferred_element_type=jnp.float32) + bias_b   # (B,S,S)

        m = jnp.max(scores, axis=-1, keepdims=True)
        p = jnp.exp(scores - m)
        denom = jnp.sum(p, axis=-1, keepdims=True)
        # exact reciprocal (approx=True error ~1e-4 would sit right at the test tolerance)
        attn = p * pl.reciprocal(denom, approx=False)

        head_out = jnp.einsum('bqk,bkd->bqd', attn, v_h,
                              preferred_element_type=jnp.float32)          # (B,S,Dh)

        # Fold this head straight into the output projection (no concat/relayout).
        acc = acc + jnp.dot(head_out.reshape(BS, Dh),
                            wc[h * Dh:(h + 1) * Dh, :],
                            preferred_element_type=jnp.float32)            # (BS, D)

    o_ref[...] = acc.astype(o_ref.dtype)


def multi_head_attention(x, padding_mask, params):
    """x: (B, S, D) f32, padding_mask: (B, S) f32 (1.0 = pad). Returns (B, S, D) f32."""
    B, S, D = x.shape
    wq, bq, wk, bk, wv, bv, wc, bc = params

    inv_scale = 1.0 / DOT_SCALE
    # One-time param prep: fold the 1/sqrt(Dh) score scaling into the Q projection and
    # fuse Q/K/V so the kernel issues a single (B*S, D) x (D, 3D) matmul.
    wqkv = jnp.concatenate([wq * inv_scale, wk, wv], axis=1)            # (D, 3D)
    bqkv = jnp.concatenate([bq * inv_scale, bk, bv]).reshape(1, 3 * D)  # (1, 3D)
    bc2 = bc.reshape(1, D)

    x2d = x.reshape(B * S, D)
    pmask = padding_mask.astype(jnp.float32)

    vmem = pl.BlockSpec(memory_space=pltpu.MemorySpace.VMEM)
    out2d = pl.pallas_call(
        mha_kernel,
        out_shape=jax.ShapeDtypeStruct((B * S, D), jnp.float32),
        in_specs=[vmem, vmem, vmem, vmem, vmem, vmem],
        out_specs=vmem,
    )(x2d, pmask, wqkv, bqkv, wc, bc2)
    return out2d.reshape(B, S, D)


def mha_reference(x, padding_mask, params):
    """Pure-JAX reference mirroring the PyTorch forward (dropout in eval mode)."""
    wq, bq, wk, bk, wv, bv, wc, bc = params
    B, S, D = x.shape
    H, Dh = NUM_HEADS, DIM_HEAD
    q = (x @ wq + bq).reshape(B, S, H, Dh).transpose(0, 2, 1, 3)    # (B,H,S,Dh)
    k = (x @ wk + bk).reshape(B, S, H, Dh)                          # (B,S,H,Dh)
    v = (x @ wv + bv).reshape(B, S, H, Dh).transpose(0, 2, 1, 3)    # (B,H,S,Dh)
    k_t = k.transpose(0, 2, 3, 1)                                   # (B,H,Dh,S)
    scores = jnp.matmul(q, k_t) / DOT_SCALE                         # (B,H,S,S)
    pm = padding_mask[:, None, None, :]                             # (B,1,1,S)
    scores = jnp.where(pm == 1.0, -jnp.inf, scores)
    attn = jax.nn.softmax(scores, axis=-1)
    out = jnp.matmul(attn, v)                                       # (B,H,S,Dh)
    out = out.transpose(0, 2, 1, 3).reshape(B, S, H * Dh)
    return out @ wc + bc


def init_params(key, D):
    ks = jax.random.split(key, 8)
    scale = 1.0 / math.sqrt(D)
    # weights stored as (D_in, D_out) so kernel does x @ W (== torch x @ W.T with W (out,in))
    wq = jax.random.uniform(ks[0], (D, D), jnp.float32, -scale, scale)
    bq = jax.random.uniform(ks[1], (D,), jnp.float32, -scale, scale)
    wk = jax.random.uniform(ks[2], (D, D), jnp.float32, -scale, scale)
    bk = jax.random.uniform(ks[3], (D,), jnp.float32, -scale, scale)
    wv = jax.random.uniform(ks[4], (D, D), jnp.float32, -scale, scale)
    bv = jax.random.uniform(ks[5], (D,), jnp.float32, -scale, scale)
    wc = jax.random.uniform(ks[6], (D, D), jnp.float32, -scale, scale)
    bc = jax.random.uniform(ks[7], (D,), jnp.float32, -scale, scale)
    return (wq, bq, wk, bk, wv, bv, wc, bc)


if __name__ == "__main__":
    key = jax.random.PRNGKey(0)
    kx, kp, km = jax.random.split(key, 3)

    x = jax.random.normal(kx, (BATCH, SEQ_LEN, DIM_MODEL), jnp.float32)
    params = init_params(kp, DIM_MODEL)

    # padding mask: last two positions of batch 1 are padded (value 1 = pad)
    padding_mask = jnp.zeros((BATCH, SEQ_LEN), jnp.float32)
    padding_mask = padding_mask.at[1, -2:].set(1.0)

    out = multi_head_attention(x, padding_mask, params)
    out = jax.block_until_ready(out)

    ref = mha_reference(x, padding_mask, params)
    assert out.shape == (BATCH, SEQ_LEN, DIM_MODEL)
    assert jnp.allclose(out, ref, atol=1e-4, rtol=1e-4), (
        f"max abs err {jnp.max(jnp.abs(out - ref))}")

    print("KERNEL_OK")
</pallas_src>

<mosaic_0001>
module attributes {stable_mosaic.version = 11 : i64} {
  func.func @mha_kernel(%arg0: memref<16x32xf32, #tpu.memory_space<vmem>>, %arg1: memref<2x8xf32, #tpu.memory_space<vmem>>, %arg2: memref<32x96xf32, #tpu.memory_space<vmem>>, %arg3: memref<1x96xf32, #tpu.memory_space<vmem>>, %arg4: memref<32x32xf32, #tpu.memory_space<vmem>>, %arg5: memref<1x32xf32, #tpu.memory_space<vmem>>, %arg6: memref<16x32xf32, #tpu.memory_space<vmem>>) attributes {dimension_semantics = [], scalar_prefetch = 0 : i64, scratch_operands = 0 : i64, tpu.core_type = #tpu.core_type<tc>} {
    %c0 = arith.constant 0 : index
    %c0_0 = arith.constant 0 : index
    %0 = vector.load %arg4[%c0, %c0_0] : memref<32x32xf32, #tpu.memory_space<vmem>>, vector<32x32xf32>
    %c0_1 = arith.constant 0 : index
    %c0_2 = arith.constant 0 : index
    %1 = vector.load %arg0[%c0_1, %c0_2] : memref<16x32xf32, #tpu.memory_space<vmem>>, vector<16x32xf32>
    %c0_3 = arith.constant 0 : index
    %c0_4 = arith.constant 0 : index
    %2 = vector.load %arg2[%c0_3, %c0_4] : memref<32x96xf32, #tpu.memory_space<vmem>>, vector<32x96xf32>
    %cst = arith.constant dense<0.000000e+00> : vector<16x96xf32>
    %3 = tpu.matmul %1, %2, %cst {dimension_numbers = #tpu.dot_dimension_numbers<[1], [0], [0], [1], [0, 0, 1, 1], [], []>} : vector<16x32xf32>, vector<32x96xf32>, vector<16x96xf32> -> vector<16x96xf32>
    %c0_5 = arith.constant 0 : index
    %c0_6 = arith.constant 0 : index
    %4 = vector.load %arg3[%c0_5, %c0_6] : memref<1x96xf32, #tpu.memory_space<vmem>>, vector<1x96xf32>
    %5 = vector.broadcast %4 : vector<1x96xf32> to vector<16x96xf32>
    %6 = arith.addf %3, %5 : vector<16x96xf32>
    %7 = vector.shape_cast %6 : vector<16x96xf32> to vector<2x8x96xf32>
    %c0_7 = arith.constant 0 : index
    %c0_8 = arith.constant 0 : index
    %8 = vector.load %arg1[%c0_7, %c0_8] : memref<2x8xf32, #tpu.memory_space<vmem>>, vector<2x8xf32>
    %cst_9 = arith.constant 5.000000e-01 : f32
    %9 = vector.broadcast %cst_9 : f32 to vector<2x8xf32>
    %10 = arith.cmpf ogt, %8, %9 : vector<2x8xf32>
    %cst_10 = arith.constant 0xFF800000 : f32
    %cst_11 = arith.constant 0.000000e+00 : f32
    %11 = vector.broadcast %cst_10 : f32 to vector<2x8xf32>
    %12 = vector.broadcast %cst_11 : f32 to vector<2x8xf32>
    %13 = arith.select %10, %11, %12 : vector<2x8xi1>, vector<2x8xf32>
    %14 = vector.shape_cast %13 : vector<2x8xf32> to vector<2x1x8xf32>
    %15 = vector.shape_cast %14 : vector<2x1x8xf32> to vector<2x1x8xf32>
    %16 = vector.broadcast %15 : vector<2x1x8xf32> to vector<2x8x8xf32>
    %c0_12 = arith.constant 0 : index
    %c0_13 = arith.constant 0 : index
    %17 = vector.load %arg5[%c0_12, %c0_13] : memref<1x32xf32, #tpu.memory_space<vmem>>, vector<1x32xf32>
    %18 = vector.shape_cast %17 : vector<1x32xf32> to vector<1x32xf32>
    %19 = vector.broadcast %18 : vector<1x32xf32> to vector<16x32xf32>
    %20 = vector.extract_strided_slice %7 {offsets = [0, 0, 0], sizes = [2, 8, 8], strides = [1, 1, 1]} : vector<2x8x96xf32> to vector<2x8x8xf32>
    %21 = vector.extract_strided_slice %7 {offsets = [0, 0, 32], sizes = [2, 8, 8], strides = [1, 1, 1]} : vector<2x8x96xf32> to vector<2x8x8xf32>
    %22 = vector.extract_strided_slice %7 {offsets = [0, 0, 64], sizes = [2, 8, 8], strides = [1, 1, 1]} : vector<2x8x96xf32> to vector<2x8x8xf32>
    "tpu.trace_start"() <{level = 10 : i32, message = "bqd,bkd->bqk"}> : () -> ()
    %cst_14 = arith.constant dense<0.000000e+00> : vector<2x8x8xf32>
    %23 = tpu.matmul %20, %21, %cst_14 {dimension_numbers = #tpu.dot_dimension_numbers<[2], [2], [1], [1], [0, 0, 0, 1, 1, 1], [0], [0]>} : vector<2x8x8xf32>, vector<2x8x8xf32>, vector<2x8x8xf32> -> vector<2x8x8xf32>
    "tpu.trace_stop"() : () -> ()
    %24 = arith.addf %23, %16 : vector<2x8x8xf32>
    %cst_15 = arith.constant dense<0xFF800000> : vector<2x8xf32>
    %25 = vector.multi_reduction <maximumf>, %24, %cst_15 [2] : vector<2x8x8xf32> to vector<2x8xf32>
    %26 = vector.shape_cast %25 : vector<2x8xf32> to vector<2x8x1xf32>
    %27 = vector.broadcast %26 : vector<2x8x1xf32> to vector<2x8x8xf32>
    %28 = arith.subf %24, %27 : vector<2x8x8xf32>
    %29 = math.exp %28 : vector<2x8x8xf32>
    %cst_16 = arith.constant dense<0.000000e+00> : vector<2x8xf32>
    %30 = vector.multi_reduction <add>, %29, %cst_16 [2] : vector<2x8x8xf32> to vector<2x8xf32>
    %31 = vector.shape_cast %30 : vector<2x8xf32> to vector<2x8x1xf32>
    %32 = tpu.reciprocal %31 : vector<2x8x1xf32> -> vector<2x8x1xf32>
    %33 = vector.broadcast %32 : vector<2x8x1xf32> to vector<2x8x8xf32>
    %34 = arith.mulf %29, %33 : vector<2x8x8xf32>
    "tpu.trace_start"() <{level = 10 : i32, message = "bqk,bkd->bqd"}> : () -> ()
    %cst_17 = arith.constant dense<0.000000e+00> : vector<2x8x8xf32>
    %35 = tpu.matmul %34, %22, %cst_17 {dimension_numbers = #tpu.dot_dimension_numbers<[2], [1], [1], [2], [0, 0, 0, 1, 1, 2], [0], [0]>} : vector<2x8x8xf32>, vector<2x8x8xf32>, vector<2x8x8xf32> -> vector<2x8x8xf32>
    "tpu.trace_stop"() : () -> ()
    %36 = vector.shape_cast %35 : vector<2x8x8xf32> to vector<16x8xf32>
    %37 = vector.extract_strided_slice %0 {offsets = [0, 0], sizes = [8, 32], strides = [1, 1]} : vector<32x32xf32> to vector<8x32xf32>
    %cst_18 = arith.constant dense<0.000000e+00> : vector<16x32xf32>
    %38 = tpu.matmul %36, %37, %cst_18 {dimension_numbers = #tpu.dot_dimension_numbers<[1], [0], [0], [1], [0, 0, 1, 1], [], []>} : vector<16x8xf32>, vector<8x32xf32>, vector<16x32xf32> -> vector<16x32xf32>
    %39 = arith.addf %19, %38 : vector<16x32xf32>
    %40 = vector.extract_strided_slice %7 {offsets = [0, 0, 8], sizes = [2, 8, 8], strides = [1, 1, 1]} : vector<2x8x96xf32> to vector<2x8x8xf32>
    %41 = vector.extract_strided_slice %7 {offsets = [0, 0, 40], sizes = [2, 8, 8], strides = [1, 1, 1]} : vector<2x8x96xf32> to vector<2x8x8xf32>
    %42 = vector.extract_strided_slice %7 {offsets = [0, 0, 72], sizes = [2, 8, 8], strides = [1, 1, 1]} : vector<2x8x96xf32> to vector<2x8x8xf32>
    "tpu.trace_start"() <{level = 10 : i32, message = "bqd,bkd->bqk"}> : () -> ()
    %cst_19 = arith.constant dense<0.000000e+00> : vector<2x8x8xf32>
    %43 = tpu.matmul %40, %41, %cst_19 {dimension_numbers = #tpu.dot_dimension_numbers<[2], [2], [1], [1], [0, 0, 0, 1, 1, 1], [0], [0]>} : vector<2x8x8xf32>, vector<2x8x8xf32>, vector<2x8x8xf32> -> vector<2x8x8xf32>
    "tpu.trace_stop"() : () -> ()
    %44 = arith.addf %43, %16 : vector<2x8x8xf32>
    %cst_20 = arith.constant dense<0xFF800000> : vector<2x8xf32>
    %45 = vector.multi_reduction <maximumf>, %44, %cst_20 [2] : vector<2x8x8xf32> to vector<2x8xf32>
    %46 = vector.shape_cast %45 : vector<2x8xf32> to vector<2x8x1xf32>
    %47 = vector.broadcast %46 : vector<2x8x1xf32> to vector<2x8x8xf32>
    %48 = arith.subf %44, %47 : vector<2x8x8xf32>
    %49 = math.exp %48 : vector<2x8x8xf32>
    %cst_21 = arith.constant dense<0.000000e+00> : vector<2x8xf32>
    %50 = vector.multi_reduction <add>, %49, %cst_21 [2] : vector<2x8x8xf32> to vector<2x8xf32>
    %51 = vector.shape_cast %50 : vector<2x8xf32> to vector<2x8x1xf32>
    %52 = tpu.reciprocal %51 : vector<2x8x1xf32> -> vector<2x8x1xf32>
    %53 = vector.broadcast %52 : vector<2x8x1xf32> to vector<2x8x8xf32>
    %54 = arith.mulf %49, %53 : vector<2x8x8xf32>
    "tpu.trace_start"() <{level = 10 : i32, message = "bqk,bkd->bqd"}> : () -> ()
    %cst_22 = arith.constant dense<0.000000e+00> : vector<2x8x8xf32>
    %55 = tpu.matmul %54, %42, %cst_22 {dimension_numbers = #tpu.dot_dimension_numbers<[2], [1], [1], [2], [0, 0, 0, 1, 1, 2], [0], [0]>} : vector<2x8x8xf32>, vector<2x8x8xf32>, vector<2x8x8xf32> -> vector<2x8x8xf32>
    "tpu.trace_stop"() : () -> ()
    %56 = vector.shape_cast %55 : vector<2x8x8xf32> to vector<16x8xf32>
    %57 = vector.extract_strided_slice %0 {offsets = [8, 0], sizes = [8, 32], strides = [1, 1]} : vector<32x32xf32> to vector<8x32xf32>
    %cst_23 = arith.constant dense<0.000000e+00> : vector<16x32xf32>
    %58 = tpu.matmul %56, %57, %cst_23 {dimension_numbers = #tpu.dot_dimension_numbers<[1], [0], [0], [1], [0, 0, 1, 1], [], []>} : vector<16x8xf32>, vector<8x32xf32>, vector<16x32xf32> -> vector<16x32xf32>
    %59 = arith.addf %39, %58 : vector<16x32xf32>
    %60 = vector.extract_strided_slice %7 {offsets = [0, 0, 16], sizes = [2, 8, 8], strides = [1, 1, 1]} : vector<2x8x96xf32> to vector<2x8x8xf32>
    %61 = vector.extract_strided_slice %7 {offsets = [0, 0, 48], sizes = [2, 8, 8], strides = [1, 1, 1]} : vector<2x8x96xf32> to vector<2x8x8xf32>
    %62 = vector.extract_strided_slice %7 {offsets = [0, 0, 80], sizes = [2, 8, 8], strides = [1, 1, 1]} : vector<2x8x96xf32> to vector<2x8x8xf32>
    "tpu.trace_start"() <{level = 10 : i32, message = "bqd,bkd->bqk"}> : () -> ()
    %cst_24 = arith.constant dense<0.000000e+00> : vector<2x8x8xf32>
    %63 = tpu.matmul %60, %61, %cst_24 {dimension_numbers = #tpu.dot_dimension_numbers<[2], [2], [1], [1], [0, 0, 0, 1, 1, 1], [0], [0]>} : vector<2x8x8xf32>, vector<2x8x8xf32>, vector<2x8x8xf32> -> vector<2x8x8xf32>
    "tpu.trace_stop"() : () -> ()
    %64 = arith.addf %63, %16 : vector<2x8x8xf32>
    %cst_25 = arith.constant dense<0xFF800000> : vector<2x8xf32>
    %65 = vector.multi_reduction <maximumf>, %64, %cst_25 [2] : vector<2x8x8xf32> to vector<2x8xf32>
    %66 = vector.shape_cast %65 : vector<2x8xf32> to vector<2x8x1xf32>
    %67 = vector.broadcast %66 : vector<2x8x1xf32> to vector<2x8x8xf32>
    %68 = arith.subf %64, %67 : vector<2x8x8xf32>
    %69 = math.exp %68 : vector<2x8x8xf32>
    %cst_26 = arith.constant dense<0.000000e+00> : vector<2x8xf32>
    %70 = vector.multi_reduction <add>, %69, %cst_26 [2] : vector<2x8x8xf32> to vector<2x8xf32>
    %71 = vector.shape_cast %70 : vector<2x8xf32> to vector<2x8x1xf32>
    %72 = tpu.reciprocal %71 : vector<2x8x1xf32> -> vector<2x8x1xf32>
    %73 = vector.broadcast %72 : vector<2x8x1xf32> to vector<2x8x8xf32>
    %74 = arith.mulf %69, %73 : vector<2x8x8xf32>
    "tpu.trace_start"() <{level = 10 : i32, message = "bqk,bkd->bqd"}> : () -> ()
    %cst_27 = arith.constant dense<0.000000e+00> : vector<2x8x8xf32>
    %75 = tpu.matmul %74, %62, %cst_27 {dimension_numbers = #tpu.dot_dimension_numbers<[2], [1], [1], [2], [0, 0, 0, 1, 1, 2], [0], [0]>} : vector<2x8x8xf32>, vector<2x8x8xf32>, vector<2x8x8xf32> -> vector<2x8x8xf32>
    "tpu.trace_stop"() : () -> ()
    %76 = vector.shape_cast %75 : vector<2x8x8xf32> to vector<16x8xf32>
    %77 = vector.extract_strided_slice %0 {offsets = [16, 0], sizes = [8, 32], strides = [1, 1]} : vector<32x32xf32> to vector<8x32xf32>
    %cst_28 = arith.constant dense<0.000000e+00> : vector<16x32xf32>
    %78 = tpu.matmul %76, %77, %cst_28 {dimension_numbers = #tpu.dot_dimension_numbers<[1], [0], [0], [1], [0, 0, 1, 1], [], []>} : vector<16x8xf32>, vector<8x32xf32>, vector<16x32xf32> -> vector<16x32xf32>
    %79 = arith.addf %59, %78 : vector<16x32xf32>
    %80 = vector.extract_strided_slice %7 {offsets = [0, 0, 24], sizes = [2, 8, 8], strides = [1, 1, 1]} : vector<2x8x96xf32> to vector<2x8x8xf32>
    %81 = vector.extract_strided_slice %7 {offsets = [0, 0, 56], sizes = [2, 8, 8], strides = [1, 1, 1]} : vector<2x8x96xf32> to vector<2x8x8xf32>
    %82 = vector.extract_strided_slice %7 {offsets = [0, 0, 88], sizes = [2, 8, 8], strides = [1, 1, 1]} : vector<2x8x96xf32> to vector<2x8x8xf32>
    "tpu.trace_start"() <{level = 10 : i32, message = "bqd,bkd->bqk"}> : () -> ()
    %cst_29 = arith.constant dense<0.000000e+00> : vector<2x8x8xf32>
    %83 = tpu.matmul %80, %81, %cst_29 {dimension_numbers = #tpu.dot_dimension_numbers<[2], [2], [1], [1], [0, 0, 0, 1, 1, 1], [0], [0]>} : vector<2x8x8xf32>, vector<2x8x8xf32>, vector<2x8x8xf32> -> vector<2x8x8xf32>
    "tpu.trace_stop"() : () -> ()
    %84 = arith.addf %83, %16 : vector<2x8x8xf32>
    %cst_30 = arith.constant dense<0xFF800000> : vector<2x8xf32>
    %85 = vector.multi_reduction <maximumf>, %84, %cst_30 [2] : vector<2x8x8xf32> to vector<2x8xf32>
    %86 = vector.shape_cast %85 : vector<2x8xf32> to vector<2x8x1xf32>
    %87 = vector.broadcast %86 : vector<2x8x1xf32> to vector<2x8x8xf32>
    %88 = arith.subf %84, %87 : vector<2x8x8xf32>
    %89 = math.exp %88 : vector<2x8x8xf32>
    %cst_31 = arith.constant dense<0.000000e+00> : vector<2x8xf32>
    %90 = vector.multi_reduction <add>, %89, %cst_31 [2] : vector<2x8x8xf32> to vector<2x8xf32>
    %91 = vector.shape_cast %90 : vector<2x8xf32> to vector<2x8x1xf32>
    %92 = tpu.reciprocal %91 : vector<2x8x1xf32> -> vector<2x8x1xf32>
    %93 = vector.broadcast %92 : vector<2x8x1xf32> to vector<2x8x8xf32>
    %94 = arith.mulf %89, %93 : vector<2x8x8xf32>
    "tpu.trace_start"() <{level = 10 : i32, message = "bqk,bkd->bqd"}> : () -> ()
    %cst_32 = arith.constant dense<0.000000e+00> : vector<2x8x8xf32>
    %95 = tpu.matmul %94, %82, %cst_32 {dimension_numbers = #tpu.dot_dimension_numbers<[2], [1], [1], [2], [0, 0, 0, 1, 1, 2], [0], [0]>} : vector<2x8x8xf32>, vector<2x8x8xf32>, vector<2x8x8xf32> -> vector<2x8x8xf32>
    "tpu.trace_stop"() : () -> ()
    %96 = vector.shape_cast %95 : vector<2x8x8xf32> to vector<16x8xf32>
    %97 = vector.extract_strided_slice %0 {offsets = [24, 0], sizes = [8, 32], strides = [1, 1]} : vector<32x32xf32> to vector<8x32xf32>
    %cst_33 = arith.constant dense<0.000000e+00> : vector<16x32xf32>
    %98 = tpu.matmul %96, %97, %cst_33 {dimension_numbers = #tpu.dot_dimension_numbers<[1], [0], [0], [1], [0, 0, 1, 1], [], []>} : vector<16x8xf32>, vector<8x32xf32>, vector<16x32xf32> -> vector<16x32xf32>
    %99 = arith.addf %79, %98 : vector<16x32xf32>
    %c0_34 = arith.constant 0 : index
    %c0_35 = arith.constant 0 : index
    %100 = vector.load %arg6[%c0_34, %c0_35] : memref<16x32xf32, #tpu.memory_space<vmem>>, vector<16x32xf32>
    tpu.vector_store %arg6[%c0_34, %c0_35], %99 {strides = array<i32>} : memref<16x32xf32, #tpu.memory_space<vmem>>, vector<16x32xf32>,
    return
  }
}

</mosaic_0001>

<bundles_post_ra>
// kernel: tpu_custom_call.1
= control target key start
LH: loop header
LB: loop body
LE: loop exit
PB: predicated region body
PF: predicated region fallthrough
CT: control target
= control target key end

     0   :  { %11 = vsyncpa [#allocation3], 0  ;;  %s1337_s0 = inlined_call_operand.hbm [shape: f32[16,32], index: 0, kind: input, shape index: {}]   ;;  %s1338_s1 = inlined_call_operand.hbm [shape: f32[2,8], index: 1, kind: input, shape index: {}]   ;;  %s1339_s2 = inlined_call_operand.hbm [shape: f32[32,96], index: 2, kind: input, shape index: {}]   ;;  %s1340_s3 = inlined_call_operand.vmem [shape: f32[1,96], index: 3, kind: input, shape index: {}]   ;;  %s1341_s4 = inlined_call_operand.hbm [shape: f32[32,32], index: 4, kind: input, shape index: {}]   ;;  %s1342_s5 = inlined_call_operand.vmem [shape: f32[1,32], index: 5, kind: input, shape index: {}]   ;;  %s1343_s6 = inlined_call_operand.hbm [shape: f32[16,32], index: 6, kind: output, shape index: {}]  }
   0x1   :  { %12 = vsyncpa [#allocation6], 0 }
   0x2   :  { %13 = vsyncpa [#allocation9], 0  ;;  %s33_s23 = sshll.u32 %s1338_s1, 4  ;;  %s34_s23 = int_to_ptr.hbm [resolvable:$true] %s33_s23 }
   0x3   :  { %14 = vsyncpa [#allocation4], 0  ;;  %s1132_s24 = smov [#allocation5]   ;;  %s19_s28 = sshll.u32 %s1337_s0, 4  ;;  %s20_s28 = int_to_ptr.hbm [resolvable:$true] %s19_s28 }
   0x4   :  { %s35_s25 = sshll.u32 %s1132_s24, 4  ;;  %s1133_s29 = smov [#allocation2]   ;;  %s36_s25 = int_to_ptr.vmem [resolvable:$true] %s35_s25 }
   0x5   :  { %38 = dma.hbm_to_vmem [thread:$0]  %s34_s23, 32, %s36_s25, [#allocation6]  }
   0x6   :  { %s21_s30 = sshll.u32 %s1133_s29, 4  ;;  %s1134_s7 = smov 128   ;;  %s22_s30 = int_to_ptr.vmem [resolvable:$true] %s21_s30 }
   0x7   :  { %s1135_s8 = smov 8   ;;  %s43_s10 = sshll.u32 %s1339_s2, 4  ;;  %s44_s10 = int_to_ptr.hbm [resolvable:$true] %s43_s10 }
   0x8   :  { %27 = dma.hbm_to_vmem [thread:$0]  %s20_s28, 256, %s22_s30, [#allocation3], %s1134_s7, %s1134_s7, %s1135_s8  }
   0x9   :  { %s1136_s11 = smov [#allocation7]   ;;  %s58_s14 = sshll.u32 %s1341_s4, 4  ;;  %s59_s14 = int_to_ptr.hbm [resolvable:$true] %s58_s14 }
   0xa   :  { %s45_s12 = sshll.u32 %s1136_s11, 4  ;;  %s1137_s15 = smov [#allocation8]   ;;  %s46_s12 = int_to_ptr.vmem [resolvable:$true] %s45_s12 }
   0xb   :  { %51 = dma.hbm_to_vmem [thread:$0]  %s44_s10, 512, %s46_s12, [#allocation6], %s1134_s7, %s1134_s7, %s1135_s8  }
   0xc   :  { %s60_s16 = sshll.u32 %s1137_s15, 4  ;;  %s61_s16 = int_to_ptr.vmem [resolvable:$true] %s60_s16 }
   0xd   :  { %66 = dma.hbm_to_vmem [thread:$0]  %s59_s14, 512, %s61_s16, [#allocation9], %s1134_s7, %s1134_s7, %s1135_s8  }
   0xe   :  { %1124 = dma.done.wait [#allocation3], 256  }
   0xf   :  { %1125 = vsyncadd [#allocation3], 4294967040 }
  0x10   :  { %1126 = dma.done.wait [#allocation6], 544  }
  0x11   :  { %1127 = vsyncadd [#allocation6], 4294966752 }
  0x12   :  { %1128 = dma.done.wait [#allocation9], 512  }
  0x13   :  { %1129 = vsyncadd [#allocation9], 4294966784  ;;  %v94_v0 = vld [vmem:[#allocation7 + $0x18] sm:$0xff]  ;;  %v93_v1 = vld [vmem:[#allocation7 + $0x10] sm:$0xff]  ;;  %vm99_vm0 = vcmask 261120   ;;  %s1138_s17 = smov 96  }
  0x14   :  { %118 = vmatpush.msra.mxu0 %v94_v0  ;;  %v92_v2 = vld [vmem:[#allocation7 + $0x8] sm:$0xff]  ;;  %v91_v3 = vld [vmem:[#allocation7] sm:$0xff]  ;;  %v90_v5 = vld [vmem:[#allocation2 + $0x8] sm:$0xff]  ;;  %s1139_s18 = smov 88   ;;  %s1140_s19 = smov 120   ;;  %vm145_vm1 = vcmask 64512  }
  0x15   :  { %v89_v4 = vld [vmem:[#allocation2] sm:$0xff]  ;;  %s1141_s20 = smov 80   ;;  %v129_v14 = vld [vmem:[#allocation5] sm:$0x3]  ;;  %v1142_v15 = vmov 0.0   ;;  %s1144_s21 = smov 112  }
  0x16   :  { %119 = vmatpush.msra.mxu0 %v93_v1  ;;  %v970_v7 = vld [vmem:[%s1340_s3] ss:$0 sm:$0xff]  ;;  %vm130_vm2 = vcmp.gt.f32.partialorder %v129_v14, 0.5  ;;  %s1143_s3 = smov 64   ;;  %v85_v59 = vld [vmem:[#allocation8] sm:$0xff]  ;;  %s1145_s22 = smov 56  }
  0x17   :  { %v131_v16 = vsel %vm130_vm2, -inf, %v1142_v15  ;;  %s1146_s23 = smov 48   ;;  %s1147_s24 = smov 72  }
  0x18   :  { %120 = vmatpush.msra.mxu0 %v92_v2  ;;  %v1230_v17 = vperm.slane %v131_v16, 0  ;;  %v133_v18 = vrot.slane %v131_v16, 1  ;;  %s1148_s25 = smov 104   ;;  %s1150_s28 = smov [#allocation10]  }
  0x19   :  { %s895_s29 = sshll.u32 %s1150_s28, 4  ;;  %s897_s9 = sshll.u32 %s1343_s6, 4  ;;  %s896_s29 = int_to_ptr.vmem [resolvable:$true] %s895_s29  ;;  %s898_s9 = int_to_ptr.hbm [resolvable:$true] %s897_s9 }
  0x1a   :  { %121 = vmatpush.msra.mxu0 %v91_v3  ;;  %v1233_v21 = vperm.slane %v133_v18, 0 }
  0x1b   :  { %912 = vmatmul.msk.f32.vlgmr.msra.gmra.mxu0 %vm99_vm0, %v89_v4 }
  0x23   :  { %913 = vmatmul.msk.f32.gmra.mxu0 %vm99_vm0, %v90_v5 }
  0x98   :  { %v123_v6 = vpop.f32.mrf.mxu0 }
  0x99   :  { %v1215_v10 = vadd.f32 %v970_v7, %v123_v6 }
  0xa0   :  { %v126_v8 = vpop.f32.mrf.mxu0 }
  0xa1   :  { %v1212_v9 = vadd.f32 %v970_v7, %v126_v8 }
  0xa3   :  { %171 = vrot.lane.b32.xlu0 %v1212_v9, %s1138_s17  ;;  %v965_v37 = vpack.i.bf16 %v1212_v9, %v1215_v10 }
  0xab   :  { %143 = vrot.lane.b32.xlu0 %v1215_v10, %s1138_s17 }
  0xb3   :  { %330 = vrot.lane.b32.xlu0 %v1215_v10, %s1139_s18 }
  0xbb   :  { %358 = vrot.lane.b32.xlu0 %v1212_v9, %s1139_s18 }
  0xc3   :  { %356 = vrot.lane.b32.xlu0 %v1212_v9, %s1140_s19 }
  0xcb   :  { %517 = vrot.lane.b32.xlu0 %v1215_v10, %s1141_s20 }
 0x115   :  { %v172_v11 = vpop.permute.xlu0 %171 }
 0x116   :  { %916 = vmatpush.xpose.msk.msra.mxu2 %vm145_vm1, %v172_v11 }
 0x119   :  { %917 = vmatmul.msk.f32.vlgmr.msra.gmra.mxu2 %vm145_vm1, %v1212_v9 }
 0x11d   :  { %v144_v12 = vpop.permute.xlu0 %143 }
 0x11e   :  { %914 = vmatpush.xpose.msk.msra.mxu1 %vm145_vm1, %v144_v12 }
 0x121   :  { %915 = vmatmul.msk.f32.vlgmr.msra.gmra.mxu1 %vm145_vm1, %v1215_v10 }
 0x125   :  { %v331_v13 = vpop.permute.xlu0 %330 }
 0x126   :  { %922 = vmatpush.xpose.msk.msrb.mxu2 %vm145_vm1, %v331_v13 }
 0x12d   :  { %v359_v39 = vpop.permute.xlu0 %358 }
 0x135   :  { %v357_v44 = vpop.permute.xlu0 %356 }
 0x13d   :  { %v518_v63 = vpop.permute.xlu0 %517 }
 0x19c   :  { %v194_v23 = vpop.f32.mrf.mxu2 }
 0x19d   :  { %v195_v24 = vadd.f32 %v194_v23, %v1233_v21  ;;  %v86_v23 = vld [vmem:[#allocation8 + $0x8] sm:$0xff] }
 0x19e   :  { %v167_v19 = vpop.f32.mrf.mxu1 }
 0x19f   :  { %v168_v20 = vadd.f32 %v167_v19, %v1230_v17  ;;  %v200_v25 = vsel %vm145_vm1, %v195_v24, -inf }
 0x1a1   :  { %v197_v22 = vsel %vm145_vm1, %v168_v20, -inf }
 0x1a2   :  { %198 = vmax.xlane.f32.xlu1 %v197_v22 }
 0x1aa   :  { %201 = vmax.xlane.f32.xlu1 %v200_v25 }
 0x1c3   :  { %328 = vrot.lane.b32.xlu1 %v1215_v10, %s1140_s19 }
 0x215   :  { %v199_v26 = vpop.xlane.xlu1 %198 }
 0x216   :  { %v203_v27 = vsub.f32 %v168_v20, %v199_v26 }
 0x218   :  { %v205_v28 = vmul.f32 1.442695, %v203_v27 }
 0x21a   :  { %972 = vpow2.f32 %v205_v28 }
 0x21d   :  { %v202_v29 = vpop.xlane.xlu1 %201 }
 0x21e   :  { %v204_v30 = vsub.f32 %v195_v24, %v202_v29 }
 0x220   :  { %v973_v31 = vpop.eup %972  ;;  %v207_v32 = vmul.f32 1.442695, %v204_v30 }
 0x221   :  { %v209_v33 = vsel %vm145_vm1, %v973_v31, 0.0 }
 0x222   :  { %974 = vpow2.f32 %v207_v32  ;;  %210 = vadd.xlane.f32.xlu2 %v209_v33 }
 0x228   :  { %v975_v34 = vpop.eup %974 }
 0x229   :  { %v212_v35 = vsel %vm145_vm1, %v975_v34, 0.0 }
 0x22a   :  { %213 = vadd.xlane.f32.xlu2 %v212_v35 }
 0x235   :  { %v329_v36 = vpop.permute.xlu1 %328 }
 0x236   :  { %923 = vmatmul.msk.f32.vlgmr.msrb.gmra.mxu2 %vm145_vm1, %v329_v36 }
 0x242   :  { %966 = vrot.lane.b32.xlu2 %v965_v37, %s1143_s3 }
 0x24a   :  { %515 = vrot.lane.b32.xlu2 %v1215_v10, %s1144_s21 }
 0x295   :  { %v211_v38 = vpop.xlane.xlu2 %210 }
 0x296   :  { %976 = vrcp.f32 %v211_v38  ;;  %v226_v45 = vand.u32 2147483648, %v211_v38  ;;  %v224_v47 = vand.u32 2147483647, %v211_v38  ;;  %vm220_vm4 = vweird.f32 %v211_v38 }
 0x298   :  { %v227_v50 = vor.u32 1.1754944e-38, %v226_v45  ;;  %vm225_vm6 = vcmp.eq.f32.partialorder %v224_v47, 8.507059e+37 }
 0x29c   :  { %v977_v40 = vpop.eup %976 }
 0x29d   :  { %v216_v41 = vmul.f32 %v977_v40, %v211_v38  ;;  %v214_v42 = vpop.xlane.xlu2 %213  ;;  %vm221_vm3 = vweird.f32 %v977_v40 }
 0x29e   :  { %978 = vrcp.f32 %v214_v42  ;;  %vm222_vm5 = vmor %vm220_vm4, %vm221_vm3  ;;  %v240_v60 = vand.u32 2147483648, %v214_v42  ;;  %v238_v62 = vand.u32 2147483647, %v214_v42  ;;  %vm234_vm8 = vweird.f32 %v214_v42 }
 0x29f   :  { %v217_v43 = vsub.f32 1.0, %v216_v41 }
 0x2a0   :  { %v241_v1 = vor.u32 1.1754944e-38, %v240_v60  ;;  %vm239_vm10 = vcmp.eq.f32.partialorder %v238_v62, 8.507059e+37 }
 0x2a1   :  { %v218_v46 = vmul.f32 %v977_v40, %v217_v43 }
 0x2a3   :  { %v219_v48 = vadd.f32 %v977_v40, %v218_v46 }
 0x2a4   :  { %v979_v49 = vpop.eup %978 }
 0x2a5   :  { %v230_v51 = vmul.f32 %v979_v49, %v214_v42  ;;  %v967_v52 = vpop.permute.xlu2 %966  ;;  %v223_v53 = vsel %vm222_vm5, %v977_v40, %v219_v48  ;;  %vm235_vm7 = vweird.f32 %v979_v49 }
 0x2a6   :  { %v968_v54 = vunpack.i.l.bf16 %v967_v52  ;;  %v969_v55 = vunpack.i.h.bf16 %v967_v52  ;;  %v228_v56 = vsel %vm225_vm6, %v227_v50, %v223_v53  ;;  %vm236_vm9 = vmor %vm234_vm8, %vm235_vm7 }
 0x2a7   :  { %v231_v57 = vsub.f32 1.0, %v230_v51  ;;  %v243_v58 = vmul.f32 %v973_v31, %v228_v56 }
 0x2a8   :  { %266 = vmatpush.msrb.mxu1 %v968_v54  ;;  %292 = vmatpush.msra.mxu3 %v969_v55 }
 0x2a9   :  { %v232_v61 = vmul.f32 %v979_v49, %v231_v57  ;;  %918 = vmatmul.msk.f32.vlgmr.msrb.gmra.mxu1 %vm145_vm1, %v243_v58 }
 0x2aa   :  { %924 = vmatpush.xpose.msk.msrb.mxu3 %vm145_vm1, %v359_v39  ;;  %318 = vmatpush.msra.mxu1 %v85_v59 }
 0x2ab   :  { %v233_v0 = vadd.f32 %v979_v49, %v232_v61 }
 0x2ac   :  { %930 = vmatpush.xpose.msk.msrb.mxu1 %vm145_vm1, %v518_v63 }
 0x2ad   :  { %v237_v2 = vsel %vm236_vm9, %v979_v49, %v233_v0  ;;  %v516_v16 = vpop.permute.xlu2 %515 }
 0x2ae   :  { %v242_v3 = vsel %vm239_vm10, %v241_v1, %v237_v2 }
 0x2af   :  { %v244_v4 = vmul.f32 %v975_v34, %v242_v3 }
 0x2b1   :  { %919 = vmatmul.msk.f32.vlgmr.msra.gmra.mxu3 %vm145_vm1, %v244_v4 }
 0x2b2   :  { %505 = vmatpush.msra.mxu3 %v86_v23 }
 0x2b9   :  { %v353_v5 = vpop.f32.mrf.mxu2  ;;  %925 = vmatmul.msk.f32.vlgmr.msrb.gmra.mxu3 %vm145_vm1, %v357_v44 }
 0x2ba   :  { %v354_v6 = vadd.f32 %v353_v5, %v1230_v17 }
 0x2bc   :  { %v384_v7 = vsel %vm145_vm1, %v354_v6, -inf }
 0x2bd   :  { %385 = vmax.xlane.f32.xlu1 %v384_v7 }
 0x326   :  { %v268_v8 = vpop.f32.mrf.mxu1 }
 0x327   :  { %920 = vmatmul.msk.f32.vlgmr.msra.gmra.mxu1 %vm145_vm1, %v268_v8 }
 0x330   :  { %v386_v11 = vpop.xlane.xlu1 %385 }
 0x331   :  { %v390_v12 = vsub.f32 %v354_v6, %v386_v11 }
 0x333   :  { %v392_v13 = vmul.f32 1.442695, %v390_v12 }
 0x334   :  { %v294_v14 = vpop.f32.mrf.mxu3 }
 0x335   :  { %980 = vpow2.f32 %v392_v13  ;;  %921 = vmatmul.msk.f32.gmra.mxu1 %vm145_vm1, %v294_v14 }
 0x33b   :  { %v981_v15 = vpop.eup %980 }
 0x33c   :  { %v381_v18 = vpop.f32.mrf.mxu3  ;;  %v396_v19 = vsel %vm145_vm1, %v981_v15, 0.0 }
 0x33d   :  { %v382_v20 = vadd.f32 %v381_v18, %v1233_v21  ;;  %397 = vadd.xlane.f32.xlu2 %v396_v19  ;;  %931 = vmatmul.msk.f32.vlgmr.msrb.gmra.mxu1 %vm145_vm1, %v516_v16 }
 0x33f   :  { %v387_v22 = vsel %vm145_vm1, %v382_v20, -inf }
 0x340   :  { %388 = vmax.xlane.f32.xlu0 %v387_v22 }
 0x354   :  { %458 = vrot.lane.b32.xlu0 %v1212_v9, %s1145_s22 }
 0x355   :  { %432 = vrot.lane.b32.xlu2 %v1215_v10, %s1145_s22 }
 0x35c   :  { %543 = vrot.lane.b32.xlu0 %v1212_v9, %s1144_s21 }
 0x35d   :  { %619 = vrot.lane.b32.xlu2 %v1215_v10, %s1146_s23 }
 0x364   :  { %704 = vrot.lane.b32.xlu0 %v1215_v10, %s1147_s24 }
 0x365   :  { %732 = vrot.lane.b32.xlu2 %v1212_v9, %s1147_s24 }
 0x36c   :  { %702 = vrot.lane.b32.xlu0 %v1215_v10, %s1148_s25 }
 0x36d   :  { %730 = vrot.lane.b32.xlu2 %v1212_v9, %s1148_s25 }
 0x3a4   :  { %v1269_v24 = vpop.f32.mrf.mxu1 }
 0x3b0   :  { %v398_v25 = vpop.xlane.xlu2 %397 }
 0x3b1   :  { %982 = vrcp.f32 %v398_v25  ;;  %v413_v34 = vand.u32 2147483648, %v398_v25  ;;  %v411_v36 = vand.u32 2147483647, %v398_v25  ;;  %vm407_vm12 = vweird.f32 %v398_v25 }
 0x3b2   :  { %v1271_v28 = vpop.f32.mrf.mxu1 }
 0x3b3   :  { %v389_v26 = vpop.xlane.xlu0 %388  ;;  %v414_v39 = vor.u32 1.1754944e-38, %v413_v34  ;;  %vm412_vm14 = vcmp.eq.f32.partialorder %v411_v36, 8.507059e+37 }
 0x3b4   :  { %v391_v27 = vsub.f32 %v382_v20, %v389_v26 }
 0x3b6   :  { %v394_v29 = vmul.f32 1.442695, %v391_v27  ;;  %v87_v27 = vld [vmem:[#allocation8 + $0x10] sm:$0xff] }
 0x3b7   :  { %v983_v30 = vpop.eup %982 }
 0x3b8   :  { %v403_v31 = vmul.f32 %v983_v30, %v398_v25  ;;  %984 = vpow2.f32 %v394_v29  ;;  %v433_v32 = vpop.permute.xlu2 %432  ;;  %vm408_vm11 = vweird.f32 %v983_v30 }
 0x3b9   :  { %453 = vmatpush.msra.mxu2 %v433_v32  ;;  %vm409_vm13 = vmor %vm407_vm12, %vm408_vm11 }
 0x3ba   :  { %v404_v33 = vsub.f32 1.0, %v403_v31  ;;  %v540_v42 = vpop.f32.mrf.mxu1 }
 0x3bb   :  { %v541_v46 = vadd.f32 %v540_v42, %v1230_v17 }
 0x3bc   :  { %v405_v35 = vmul.f32 %v983_v30, %v404_v33 }
 0x3bd   :  { %v571_v48 = vsel %vm145_vm1, %v541_v46, -inf }
 0x3be   :  { %v985_v37 = vpop.eup %984  ;;  %v406_v38 = vadd.f32 %v983_v30, %v405_v35 }
 0x3bf   :  { %v399_v40 = vsel %vm145_vm1, %v985_v37, 0.0 }
 0x3c0   :  { %v410_v41 = vsel %vm409_vm13, %v983_v30, %v406_v38  ;;  %v620_v43 = vpop.permute.xlu2 %619  ;;  %400 = vadd.xlane.f32.xlu1 %v399_v40  ;;  %v1295_v30 = vld [vmem:[%s1342_s5] ss:$0 sm:$0xff]  ;;  %s1149_s5 = smov 40  }
 0x3c1   :  { %v415_v44 = vsel %vm412_vm14, %v414_v39, %v410_v41  ;;  %v327_v31 = vadd.f32 %v1295_v30, %v1271_v28 }
 0x3c2   :  { %v430_v45 = vmul.f32 %v981_v15, %v415_v44 }
 0x3c4   :  { %926 = vmatmul.msk.f32.vlgmr.msra.gmra.mxu2 %vm145_vm1, %v430_v45 }
 0x3c6   :  { %v459_v47 = vpop.permute.xlu0 %458 }
 0x3c7   :  { %479 = vmatpush.msrb.mxu0 %v459_v47 }
 0x3c8   :  { %v733_v49 = vpop.permute.xlu2 %732  ;;  %572 = vmax.xlane.f32.xlu1 %v571_v48 }
 0x3c9   :  { %640 = vmatpush.msra.mxu0 %v620_v43  ;;  %940 = vmatpush.xpose.msk.msrb.mxu3 %vm145_vm1, %v733_v49 }
 0x3ce   :  { %v544_v55 = vpop.permute.xlu0 %543 }
 0x3d0   :  { %v731_v19 = vpop.permute.xlu2 %730 }
 0x3d6   :  { %v705_v3 = vpop.permute.xlu0 %704 }
 0x3de   :  { %v703_v26 = vpop.permute.xlu0 %702 }
 0x433   :  { %v401_v50 = vpop.xlane.xlu1 %400 }
 0x434   :  { %986 = vrcp.f32 %v401_v50  ;;  %v427_v57 = vand.u32 2147483648, %v401_v50  ;;  %v425_v60 = vand.u32 2147483647, %v401_v50  ;;  %vm421_vm2 = vweird.f32 %v401_v50 }
 0x436   :  { %v428_v62 = vor.u32 1.1754944e-38, %v427_v57  ;;  %vm426_vm4 = vcmp.eq.f32.partialorder %v425_v60, 8.507059e+37 }
 0x43a   :  { %v987_v51 = vpop.eup %986 }
 0x43b   :  { %v417_v52 = vmul.f32 %v987_v51, %v401_v50  ;;  %v573_v53 = vpop.xlane.xlu1 %572  ;;  %vm422_vm15 = vweird.f32 %v987_v51 }
 0x43c   :  { %v577_v54 = vsub.f32 %v541_v46, %v573_v53  ;;  %vm423_vm3 = vmor %vm421_vm2, %vm422_vm15 }
 0x43d   :  { %v418_v56 = vsub.f32 1.0, %v417_v52 }
 0x43e   :  { %v579_v58 = vmul.f32 1.442695, %v577_v54 }
 0x43f   :  { %v419_v59 = vmul.f32 %v987_v51, %v418_v56 }
 0x440   :  { %988 = vpow2.f32 %v579_v58 }
 0x441   :  { %v420_v61 = vadd.f32 %v987_v51, %v419_v59 }
 0x443   :  { %v424_v63 = vsel %vm423_vm3, %v987_v51, %v420_v61 }
 0x444   :  { %v429_v0 = vsel %vm426_vm4, %v428_v62, %v424_v63 }
 0x445   :  { %v431_v1 = vmul.f32 %v985_v37, %v429_v0 }
 0x446   :  { %v989_v2 = vpop.eup %988 }
 0x447   :  { %v455_v4 = vpop.f32.mrf.mxu2  ;;  %927 = vmatmul.msk.f32.vlgmr.msrb.gmra.mxu0 %vm145_vm1, %v431_v1  ;;  %v583_v5 = vsel %vm145_vm1, %v989_v2, 0.0 }
 0x448   :  { %938 = vmatpush.xpose.msk.msrb.mxu0 %vm145_vm1, %v705_v3  ;;  %928 = vmatmul.msk.f32.vlgmr.msra.gmra.mxu3 %vm145_vm1, %v455_v4 }
 0x449   :  { %584 = vadd.xlane.f32.xlu1 %v583_v5 }
 0x462   :  { %545 = vrot.lane.b32.xlu1 %v1212_v9, %s1141_s20 }
 0x4bc   :  { %v585_v6 = vpop.xlane.xlu1 %584 }
 0x4bd   :  { %990 = vrcp.f32 %v585_v6  ;;  %v600_v13 = vand.u32 2147483648, %v585_v6  ;;  %v598_v15 = vand.u32 2147483647, %v585_v6  ;;  %vm594_vm6 = vweird.f32 %v585_v6 }
 0x4bf   :  { %v601_v18 = vor.u32 1.1754944e-38, %v600_v13  ;;  %vm599_vm8 = vcmp.eq.f32.partialorder %v598_v15, 8.507059e+37 }
 0x4c3   :  { %v991_v7 = vpop.eup %990 }
 0x4c4   :  { %v590_v8 = vmul.f32 %v991_v7, %v585_v6  ;;  %v481_v11 = vpop.f32.mrf.mxu0  ;;  %vm595_vm5 = vweird.f32 %v991_v7 }
 0x4c5   :  { %929 = vmatmul.msk.f32.gmra.mxu3 %vm145_vm1, %v481_v11  ;;  %vm596_vm7 = vmor %vm594_vm6, %vm595_vm5 }
 0x4c6   :  { %v591_v12 = vsub.f32 1.0, %v590_v8 }
 0x4c8   :  { %v592_v14 = vmul.f32 %v991_v7, %v591_v12 }
 0x4ca   :  { %v593_v16 = vadd.f32 %v991_v7, %v592_v14 }
 0x4cb   :  { %v1290_v29 = vpop.f32.mrf.mxu3 }
 0x4cc   :  { %v597_v20 = vsel %vm596_vm7, %v991_v7, %v593_v16 }
 0x4cd   :  { %v602_v22 = vsel %vm599_vm8, %v601_v18, %v597_v20  ;;  %941 = vmatmul.msk.f32.vlgmr.msrb.gmra.mxu3 %vm145_vm1, %v731_v19 }
 0x4ce   :  { %v617_v23 = vmul.f32 %v989_v2, %v602_v22 }
 0x4d0   :  { %934 = vmatmul.msk.f32.vlgmr.msra.gmra.mxu0 %vm145_vm1, %v617_v23 }
 0x4d4   :  { %v546_v25 = vpop.permute.xlu1 %545 }
 0x4d5   :  { %932 = vmatpush.xpose.msk.msrb.mxu2 %vm145_vm1, %v546_v25 }
 0x4d8   :  { %933 = vmatmul.msk.f32.vlgmr.msrb.gmra.mxu2 %vm145_vm1, %v544_v55  ;;  %939 = vmatmul.msk.f32.vlgmr.msrb.gmra.mxu0 %vm145_vm1, %v703_v26 }
 0x4d9   :  { %692 = vmatpush.msra.mxu2 %v87_v27 }
 0x548   :  { %v510_v32 = vpop.f32.mrf.mxu3 }
 0x549   :  { %v1299_v33 = vadd.f32 %v510_v32, %v327_v31 }
 0x54d   :  { %v642_v34 = vpop.f32.mrf.mxu0 }
 0x54e   :  { %936 = vmatmul.msk.f32.vlgmr.msra.gmra.mxu2 %vm145_vm1, %v642_v34 }
 0x550   :  { %v755_v35 = vpop.f32.mrf.mxu3 }
 0x551   :  { %v756_v36 = vadd.f32 %v755_v35, %v1233_v21 }
 0x553   :  { %v761_v37 = vsel %vm145_vm1, %v756_v36, -inf }
 0x554   :  { %762 = vmax.xlane.f32.xlu2 %v761_v37 }
 0x555   :  { %v727_v38 = vpop.f32.mrf.mxu0 }
 0x556   :  { %v728_v39 = vadd.f32 %v727_v38, %v1230_v17  ;;  %v88_v38 = vld [vmem:[#allocation8 + $0x18] sm:$0xff] }
 0x557   :  { %879 = vmatpush.msra.mxu3 %v88_v38 }
 0x558   :  { %v758_v40 = vsel %vm145_vm1, %v728_v39, -inf }
 0x559   :  { %759 = vmax.xlane.f32.xlu0 %v758_v40 }
 0x55b   :  { %v568_v41 = vpop.f32.mrf.mxu2 }
 0x55c   :  { %v569_v28 = vadd.f32 %v568_v41, %v1233_v21 }
 0x55e   :  { %v574_v42 = vsel %vm145_vm1, %v569_v28, -inf }
 0x55f   :  { %575 = vmax.xlane.f32.xlu1 %v574_v42 }
 0x5c7   :  { %v763_v43 = vpop.xlane.xlu2 %762 }
 0x5c8   :  { %v765_v44 = vsub.f32 %v756_v36, %v763_v43 }
 0x5ca   :  { %v768_v45 = vmul.f32 1.442695, %v765_v44 }
 0x5cc   :  { %992 = vpow2.f32 %v768_v45  ;;  %v760_v46 = vpop.xlane.xlu0 %759 }
 0x5cd   :  { %v764_v47 = vsub.f32 %v728_v39, %v760_v46 }
 0x5cf   :  { %v766_v48 = vmul.f32 1.442695, %v764_v47 }
 0x5d1   :  { %994 = vpow2.f32 %v766_v48  ;;  %v694_v42 = vpop.f32.mrf.mxu2 }
 0x5d2   :  { %v993_v49 = vpop.eup %992  ;;  %v576_v50 = vpop.xlane.xlu1 %575 }
 0x5d3   :  { %v578_v17 = vsub.f32 %v569_v28, %v576_v50  ;;  %v773_v51 = vsel %vm145_vm1, %v993_v49, 0.0  ;;  %v326_v28 = vadd.f32 %v1295_v30, %v1269_v24 }
 0x5d4   :  { %774 = vadd.xlane.f32.xlu2 %v773_v51 }
 0x5d5   :  { %v581_v52 = vmul.f32 1.442695, %v578_v17  ;;  %v513_v43 = vadd.f32 %v1290_v29, %v326_v28 }
 0x5d7   :  { %v1309_v53 = vpop.eup %994  ;;  %996 = vpow2.f32 %v581_v52  ;;  %v700_v44 = vadd.f32 %v694_v42, %v513_v43 }
 0x5d8   :  { %v770_v21 = vsel %vm145_vm1, %v1309_v53, 0.0 }
 0x5d9   :  { %771 = vadd.xlane.f32.xlu0 %v770_v21 }
 0x5dd   :  { %v997_v54 = vpop.eup %996 }
 0x5de   :  { %v586_v55 = vsel %vm145_vm1, %v997_v54, 0.0 }
 0x5df   :  { %587 = vadd.xlane.f32.xlu1 %v586_v55 }
 0x5ec   :  { %832 = vrot.lane.b32.xlu2 %v1212_v9, %s1149_s5 }
 0x5ed   :  { %806 = vrot.lane.b32.xlu0 %v1215_v10, %s1149_s5 }
 0x5f8   :  { %645 = vrot.lane.b32.xlu1 %v1212_v9, %s1146_s23 }
 0x647   :  { %v775_v56 = vpop.xlane.xlu2 %774 }
 0x648   :  { %998 = vrcp.f32 %v775_v56  ;;  %v801_v62 = vand.u32 2147483648, %v775_v56  ;;  %v799_v1 = vand.u32 2147483647, %v775_v56  ;;  %vm795_vm10 = vweird.f32 %v775_v56 }
 0x64a   :  { %v802_v10 = vor.u32 1.1754944e-38, %v801_v62  ;;  %vm800_vm12 = vcmp.eq.f32.partialorder %v799_v1, 8.507059e+37 }
 0x64c   :  { %v772_v59 = vpop.xlane.xlu0 %771 }
 0x64d   :  { %1000 = vrcp.f32 %v772_v59  ;;  %v787_v25 = vand.u32 2147483648, %v772_v59  ;;  %vm781_vm4 = vweird.f32 %v772_v59  ;;  %v785_v26 = vand.u32 2147483647, %v772_v59 }
 0x64e   :  { %v999_v57 = vpop.eup %998 }
 0x64f   :  { %v791_v58 = vmul.f32 %v999_v57, %v775_v56  ;;  %v833_v60 = vpop.permute.xlu2 %832  ;;  %vm796_vm9 = vweird.f32 %v999_v57  ;;  %v788_v35 = vor.u32 1.1754944e-38, %v787_v25  ;;  %vm786_vm6 = vcmp.eq.f32.partialorder %v785_v26, 8.507059e+37 }
 0x650   :  { %853 = vmatpush.msra.mxu0 %v833_v60  ;;  %vm797_vm11 = vmor %vm795_vm10, %vm796_vm9 }
 0x651   :  { %v792_v61 = vsub.f32 1.0, %v791_v58 }
 0x652   :  { %v588_v63 = vpop.xlane.xlu1 %587 }
 0x653   :  { %v793_v0 = vmul.f32 %v999_v57, %v792_v61  ;;  %1002 = vrcp.f32 %v588_v63  ;;  %v1001_v3 = vpop.eup %1000  ;;  %v614_v15 = vand.u32 2147483648, %v588_v63  ;;  %vm608_vm14 = vweird.f32 %v588_v63 }
 0x654   :  { %v777_v8 = vmul.f32 %v1001_v3, %v772_v59  ;;  %v612_v16 = vand.u32 2147483647, %v588_v63  ;;  %vm782_vm3 = vweird.f32 %v1001_v3 }
 0x655   :  { %v794_v2 = vadd.f32 %v999_v57, %v793_v0  ;;  %v615_v20 = vor.u32 1.1754944e-38, %v614_v15  ;;  %vm783_vm5 = vmor %vm781_vm4, %vm782_vm3 }
 0x656   :  { %v778_v13 = vsub.f32 1.0, %v777_v8  ;;  %vm613_vm2 = vcmp.eq.f32.partialorder %v612_v16, 8.507059e+37 }
 0x657   :  { %v798_v9 = vsel %vm797_vm11, %v999_v57, %v794_v2 }
 0x658   :  { %v803_v4 = vsel %vm800_vm12, %v802_v10, %v798_v9  ;;  %v779_v18 = vmul.f32 %v1001_v3, %v778_v13 }
 0x659   :  { %v1003_v5 = vpop.eup %1002  ;;  %v805_v6 = vmul.f32 %v993_v49, %v803_v4 }
 0x65a   :  { %v604_v7 = vmul.f32 %v1003_v5, %v588_v63  ;;  %vm609_vm13 = vweird.f32 %v1003_v5  ;;  %v780_v23 = vadd.f32 %v1001_v3, %v779_v18 }
 0x65b   :  { %943 = vmatmul.msk.f32.vlgmr.msra.gmra.mxu0 %vm145_vm1, %v805_v6  ;;  %vm610_vm15 = vmor %vm608_vm14, %vm609_vm13 }
 0x65c   :  { %v605_v11 = vsub.f32 1.0, %v604_v7  ;;  %v784_v32 = vsel %vm783_vm5, %v1001_v3, %v780_v23 }
 0x65d   :  { %v789_v36 = vsel %vm786_vm6, %v788_v35, %v784_v32 }
 0x65e   :  { %v606_v12 = vmul.f32 %v1003_v5, %v605_v11  ;;  %v804_v37 = vmul.f32 %v1309_v53, %v789_v36 }
 0x65f   :  { %v807_v34 = vpop.permute.xlu0 %806 }
 0x660   :  { %v607_v14 = vadd.f32 %v1003_v5, %v606_v12 }
 0x662   :  { %v611_v19 = vsel %vm610_vm15, %v1003_v5, %v607_v14 }
 0x663   :  { %v616_v22 = vsel %vm613_vm2, %v615_v20, %v611_v19 }
 0x664   :  { %v618_v31 = vmul.f32 %v997_v54, %v616_v22 }
 0x66a   :  { %v646_v27 = vpop.permute.xlu1 %645 }
 0x66b   :  { %666 = vmatpush.msra.mxu1 %v646_v27 }
 0x66c   :  { %935 = vmatmul.msk.f32.vlgmr.msra.gmra.mxu1 %vm145_vm1, %v618_v31 }
 0x66d   :  { %827 = vmatpush.msrb.mxu1 %v807_v34 }
 0x674   :  { %942 = vmatmul.msk.f32.vlgmr.msrb.gmra.mxu1 %vm145_vm1, %v804_v37 }
 0x6d8   :  { %v855_v41 = vpop.f32.mrf.mxu0 }
 0x6e9   :  { %v668_v39 = vpop.f32.mrf.mxu1 }
 0x6ea   :  { %937 = vmatmul.msk.f32.gmra.mxu2 %vm145_vm1, %v668_v39 }
 0x6f1   :  { %v829_v40 = vpop.f32.mrf.mxu1 }
 0x6f2   :  { %944 = vmatmul.msk.f32.vlgmr.msra.gmra.mxu3 %vm145_vm1, %v829_v40 }
 0x6fa   :  { %945 = vmatmul.msk.f32.gmra.mxu3 %vm145_vm1, %v855_v41 }
 0x76d   :  { %v697_v47 = vpop.f32.mrf.mxu2 }
 0x76e   :  { %v701_v48 = vadd.f32 %v697_v47, %v1299_v33 }
 0x775   :  { %v881_v45 = vpop.f32.mrf.mxu3 }
 0x776   :  { %v887_v46 = vadd.f32 %v881_v45, %v700_v44 }
 0x778   :  { %889 = vst.msk [vmem:[#allocation10] sm:$0xff] %vm99_vm0, %v887_v46 }
 0x77d   :  { %v884_v49 = vpop.f32.mrf.mxu3 }
 0x77e   :  { %v888_v50 = vadd.f32 %v884_v49, %v701_v48 }
 0x780   :  { %890 = vst.msk [vmem:[#allocation10 + $0x8] sm:$0xff] %vm99_vm0, %v888_v50 }
 0x781   :  { %903 = dma.vmem_to_hbm [thread:$0]  %s896_s29, 256, %s898_s9, [#allocation4], %s1134_s7, %s1134_s7, %s1135_s8  }
 0x782   :  { %1130 = dma.done.wait [#allocation4], 256  }
 0x783   :  { %1131 = vsyncadd [#allocation4], 4294967040 }
 0x784   :  { %908 = vsyncpa [#allocation3], 1 }
 0x785   :  { %909 = vsyncpa [#allocation6], 1 }
 0x786   :  { %910 = vsyncpa [#allocation9], 1 }
 0x787   :  { %911 = vsyncpa [#allocation4], 1 }

</bundles_post_ra>
